<compile_context>
chip_gen: v7x
topology: tpu7x:2x2x1
jax: 0.10.0
libtpu: 0.0.40
codegen_flags: <defaults>
</compile_context>

<pallas_src>
import functools

import jax
import jax.numpy as jnp
from jax.experimental import pallas as pl
from jax.experimental.pallas import tpu as pltpu


@functools.lru_cache(maxsize=None)
def _lane_roll_sign():
    """Pin pltpu.roll's rotation convention once with a tiny 1-vreg probe.

    Returns +1 if pltpu.roll follows jnp.roll (result[i] = x[(i - shift) % N]),
    -1 if it rotates the other way.  The kernel's static tap shifts are derived
    from this, so the lane shifts are correct under either convention.
    Memoized: runs a single (8,128) kernel once per process.
    """
    def probe(x_ref, o_ref):
        o_ref[...] = pltpu.roll(x_ref[...], 1, 1)

    x = jnp.broadcast_to(jnp.arange(128, dtype=jnp.int32), (8, 128))
    y = pl.pallas_call(
        probe, out_shape=jax.ShapeDtypeStruct((8, 128), jnp.int32))(x)
    return 1 if int(y[0, 0]) == 127 else -1


def _fusion_block_kernel(x_ref, w_ref, b_ref, o_ref, *,
                         h, w, k, nb, cmid, roll_sign):
    # x_ref : (nb, Cmid, HW)          one image (or the whole folded batch),
    #                                 channels already zero-padded to Cmid
    # w_ref : (4, Cmax, K*K*Cmid)     tap-major packed weights, all layers
    # b_ref : (4, Cmax, 1)
    # o_ref : (nb, Cout, HW)          lane-dense; reshapes straight to NCHW
    pad = (k - 1) // 2
    hw = h * w
    lanes = nb * hw
    f32 = jnp.float32

    # ---- hoisted zero-padding masks: one bool (Cmid, lanes) per (dy, dx) ----
    # Tap validity depends only on the output pixel's (row, col) inside its own
    # image (lane index mod H*W).  Computed once per invocation, reused by all
    # four layers, pre-broadcast so no broadcast_in_dim is re-emitted per use.
    lane = jax.lax.broadcasted_iota(jnp.int32, (cmid, lanes), 1)
    q = (lane & (hw - 1)) if (hw & (hw - 1)) == 0 else lane % hw
    if (w & (w - 1)) == 0:
        col = q & (w - 1)
        row = q >> (w.bit_length() - 1)
    else:                                   # non power-of-two spatial size
        col = q % w
        row = q // w
    masks = {}
    for dy in range(-pad, pad + 1):
        r_ok = None
        if dy < 0:
            r_ok = row >= -dy
        elif dy > 0:
            r_ok = row < h - dy
        for dx in range(-pad, pad + 1):
            c_ok = None
            if dx < 0:
                c_ok = col >= -dx
            elif dx > 0:
                c_ok = col < w - dx
            if r_ok is None:
                masks[(dy, dx)] = c_ok
            elif c_ok is None:
                masks[(dy, dx)] = r_ok
            else:
                masks[(dy, dx)] = r_ok & c_ok

    def im2col(act):
        # (Cmid, lanes) -> (K*K*Cmid, lanes), built entirely in registers:
        # each tap is an XLU lane rotation of `act` by dy*W+dx, zero-masked at
        # the image borders (the masks also kill wrap-around / cross-image lanes).
        parts = []
        for ky in range(k):
            for kx in range(k):
                dy, dx = ky - pad, kx - pad
                s = dy * w + dx
                if s == 0:
                    t = act
                else:
                    t = pltpu.roll(act, (-roll_sign * s) % lanes, 1)
                m = masks[(dy, dx)]
                if m is not None:
                    t = jnp.where(m, t, 0.0)
                parts.append(t)
        return jnp.concatenate(parts, axis=0)

    def conv_relu(act, layer):
        # One MXU matmul covers all 9 taps (K = 9*Cmid, identical for all layers).
        y = jnp.dot(w_ref[layer], im2col(act), preferred_element_type=f32)
        return jnp.maximum(y + b_ref[layer], 0.0)       # (Cmax, lanes)

    # Layer-1 activation (input channels already padded to Cmid in the wrapper).
    if nb == 1:
        act = x_ref[0].astype(f32)
    else:
        act = jnp.concatenate([x_ref[b].astype(f32) for b in range(nb)], axis=1)

    y = conv_relu(act, 0)              # Cin(->Cmid) -> Cmid (rows >= Cmid are 0)
    y = conv_relu(y[:cmid, :], 1)      # Cmid -> Cmid
    y = conv_relu(y[:cmid, :], 2)      # Cmid -> Cmid
    y = conv_relu(y[:cmid, :], 3)      # Cmid -> 2*out_block (fused branch convs)

    # Lane-dense, 128-aligned stores; (nb, Cout, HW) reshapes straight to NCHW.
    for b in range(nb):
        o_ref[b] = y[:, b * hw:(b + 1) * hw].astype(o_ref.dtype)


def pack_fusion_block_params(params):
    """One-time repack of PyTorch-layout conv params into the kernel layout.

    Returns (W, B, meta):
      W[l, o, (ky*K+kx)*Cmid + ci] = w_l[o, ci, ky, kx]  (zero-padded in o and ci)
      B[l, o, 0]                   = b_l[o]              (zero-padded in o)
    so the kernel needs only two tensor inputs and every layer shares the same
    (Cmax, K*K*Cmid) matmul shape.  The two branch convs are concatenated along
    Cout (== torch.cat([x0, x1], dim=1))."""
    w1, b1 = params['conv1_1']
    w2, b2 = params['conv1_2']
    w3, b3 = params['conv1_3']
    w00, b00 = params['conv1_0_00']
    w01, b01 = params['conv1_0_01']
    w4 = jnp.concatenate([w00, w01], axis=0)
    b4 = jnp.concatenate([b00, b01], axis=0)

    cmid, cin, k, _ = w1.shape
    cout = w4.shape[0]
    cmax = max(cmid, cout)
    if cin > cmid:
        raise NotImplementedError("kernel assumes in_block <= out_block")

    def pack(wl, bl):
        co, ci = wl.shape[0], wl.shape[1]
        wl = jnp.pad(wl, ((0, cmax - co), (0, cmid - ci), (0, 0), (0, 0)))
        bl = jnp.pad(bl, ((0, cmax - co),))
        wp = jnp.transpose(wl, (0, 2, 3, 1)).reshape(cmax, k * k * cmid)
        return wp.astype(jnp.float32), bl.reshape(cmax, 1).astype(jnp.float32)

    packs = [pack(w1, b1), pack(w2, b2), pack(w3, b3), pack(w4, b4)]
    W = jnp.stack([p[0] for p in packs])          # (4, Cmax, K*K*Cmid)
    B = jnp.stack([p[1] for p in packs])          # (4, Cmax, 1)
    meta = dict(cin=cin, cmid=cmid, cout=cout, k=k)
    return W, B, meta


def _default_fold_batch(n):
    """Fold the batch into the lane axis on single-TensorCore chips (v2-v6):
    one grid step, one in/out DMA, wider matmul lanes.  Keep the parallel (N,)
    grid on dual-TC v7x so each core takes one image."""
    if n <= 1:
        return True
    try:
        kind = jax.devices()[0].device_kind.lower()
    except Exception:
        return True
    return "v7" not in kind and "7x" not in kind


def fusion_block_forward(x_nchw, packed, fold_batch=None):
    W, B, meta = packed
    n, cin, h, w = x_nchw.shape
    if cin != meta['cin']:
        raise ValueError("input channels do not match packed params")
    k, cmid, cout = meta['k'], meta['cmid'], meta['cout']
    hw = h * w
    if fold_batch is None:
        fold_batch = _default_fold_batch(n)
    nb = n if fold_batch else 1

    # NCHW -> (N, C, HW) is a reshape only; the tiny channel zero-pad (layout
    # plumbing) makes every layer share the same K = 9*Cmid operand shape.
    x_flat = x_nchw.reshape(n, cin, hw)
    if cmid > cin:
        x_flat = jnp.pad(x_flat, ((0, 0), (0, cmid - cin), (0, 0)))

    kernel = functools.partial(
        _fusion_block_kernel, h=h, w=w, k=k, nb=nb, cmid=cmid,
        roll_sign=_lane_roll_sign())

    if fold_batch:
        x_spec = pl.BlockSpec((nb, cmid, hw), lambda i: (0, 0, 0))
        o_spec = pl.BlockSpec((nb, cout, hw), lambda i: (0, 0, 0))
        grid = (1,)
    else:
        x_spec = pl.BlockSpec((1, cmid, hw), lambda i: (i, 0, 0))
        o_spec = pl.BlockSpec((1, cout, hw), lambda i: (i, 0, 0))
        grid = (n,)

    out = pl.pallas_call(
        kernel,
        out_shape=jax.ShapeDtypeStruct((n, cout, hw), x_nchw.dtype),
        grid=grid,
        in_specs=[x_spec,
                  pl.BlockSpec(W.shape, lambda i: (0, 0, 0)),
                  pl.BlockSpec(B.shape, lambda i: (0, 0, 0))],
        out_specs=o_spec,
        compiler_params=pltpu.CompilerParams(
            dimension_semantics=("parallel",)),
    )(x_flat, W, B)

    # (N, Cout, HW) is already channels-first -> NCHW via reshape only.
    return out.reshape(n, cout, h, w)


# ---------- pure-JAX reference (for correctness check only) ----------
def _conv3x3_relu_ref(x_nhwc, w_oikk, b, k_size=3):
    n, h, w, cin = x_nhwc.shape
    pad = (k_size - 1) // 2
    xp = jnp.pad(x_nhwc, ((0, 0), (pad, pad), (pad, pad), (0, 0)))
    w_kkio = jnp.transpose(w_oikk, (2, 3, 1, 0))
    acc = jnp.zeros((n, h, w, w_oikk.shape[0]), jnp.float32)
    for ky in range(k_size):
        for kx in range(k_size):
            acc = acc + jnp.einsum('nhwc,co->nhwo',
                                   xp[:, ky:ky + h, kx:kx + w, :],
                                   w_kkio[ky, kx],
                                   precision=jax.lax.Precision.HIGHEST)
    return jnp.maximum(acc + b, 0.0)


def _fusion_block_ref(x_nchw, params, k_size=3):
    x = jnp.transpose(x_nchw, (0, 2, 3, 1))
    x = _conv3x3_relu_ref(x, *params['conv1_1'], k_size=k_size)
    x = _conv3x3_relu_ref(x, *params['conv1_2'], k_size=k_size)
    x = _conv3x3_relu_ref(x, *params['conv1_3'], k_size=k_size)
    x0 = _conv3x3_relu_ref(x, *params['conv1_0_00'], k_size=k_size)
    x1 = _conv3x3_relu_ref(x, *params['conv1_0_01'], k_size=k_size)
    y = jnp.concatenate([x0, x1], axis=-1)
    return jnp.transpose(y, (0, 3, 1, 2))


def init_conv_params(key, cin, cout, k):
    # deterministic synthetic init (PyTorch Conv2d-like uniform bound)
    kw, kb = jax.random.split(key)
    fan_in = cin * k * k
    bound = 1.0 / (fan_in ** 0.5)
    w = jax.random.uniform(kw, (cout, cin, k, k), jnp.float32, -bound, bound)
    b = jax.random.uniform(kb, (cout,), jnp.float32, -bound, bound)
    return w, b


if __name__ == "__main__":
    in_block, out_block, k_size = 4, 8, 3
    n, h, w = 2, 16, 16

    key = jax.random.PRNGKey(0)
    keys = jax.random.split(key, 6)
    params = {
        'conv1_1':    init_conv_params(keys[0], in_block, out_block, k_size),
        'conv1_2':    init_conv_params(keys[1], out_block, out_block, k_size),
        'conv1_3':    init_conv_params(keys[2], out_block, out_block, k_size),
        'conv1_0_00': init_conv_params(keys[3], out_block, out_block, k_size),
        'conv1_0_01': init_conv_params(keys[4], out_block, out_block, k_size),
    }
    x = jax.random.normal(keys[5], (n, in_block, h, w), jnp.float32)

    packed = pack_fusion_block_params(params)          # hoisted, done once
    y_ref = jax.block_until_ready(_fusion_block_ref(x, params, k_size))

    ok = True
    max_err = 0.0
    # Exercise the generation-auto mode and the other batching mode too
    # (batch folded into lanes for single-TC chips / per-image parallel grid
    # for dual-TC v7x); both must match the reference.
    for fold in (None, not _default_fold_batch(n)):
        y = jax.block_until_ready(fusion_block_forward(x, packed, fold_batch=fold))
        ok &= (y.shape == (n, 2 * out_block, h, w))
        ok &= bool(jnp.allclose(y, y_ref, atol=2e-3, rtol=2e-3))
        max_err = max(max_err, float(jnp.max(jnp.abs(y - y_ref))))

    if ok:
        print("KERNEL_OK")
    else:
        print(f"MISMATCH max_abs_err={max_err}")
</pallas_src>

<mosaic_0001>
module attributes {stable_mosaic.version = 11 : i64} {
  func.func @probe(%arg0: memref<8x128xi32, #tpu.memory_space<vmem>>, %arg1: memref<8x128xi32, #tpu.memory_space<vmem>>) attributes {dimension_semantics = [], scalar_prefetch = 0 : i64, scratch_operands = 0 : i64, tpu.core_type = #tpu.core_type<tc>} {
    %c0 = arith.constant 0 : index
    %c0_0 = arith.constant 0 : index
    %0 = vector.load %arg0[%c0, %c0_0] : memref<8x128xi32, #tpu.memory_space<vmem>>, vector<8x128xi32>
    %c1_i32 = arith.constant 1 : i32
    %1 = tpu.dynamic_rotate %0 by %c1_i32 dim 1 : vector<8x128xi32>, i32 -> vector<8x128xi32>
    %c0_1 = arith.constant 0 : index
    %c0_2 = arith.constant 0 : index
    %2 = vector.load %arg1[%c0_1, %c0_2] : memref<8x128xi32, #tpu.memory_space<vmem>>, vector<8x128xi32>
    tpu.vector_store %arg1[%c0_1, %c0_2], %1 {strides = array<i32>} : memref<8x128xi32, #tpu.memory_space<vmem>>, vector<8x128xi32>,
    return
  }
}

</mosaic_0001>

<bundles_post_ra>
// kernel: tpu_custom_call.1
= control target key start
LH: loop header
LB: loop body
LE: loop exit
PB: predicated region body
PF: predicated region fallthrough
CT: control target
= control target key end

     0   :  { %6 = vsyncpa [#allocation3], 0  ;;  %s128_s0 = inlined_call_operand.hbm [shape: s32[8,128], index: 0, kind: input, shape index: {}]   ;;  %s129_s1 = inlined_call_operand.hbm [shape: s32[8,128], index: 1, kind: output, shape index: {}]  }
   0x1   :  { %7 = vsyncpa [#allocation4], 0  ;;  %s91_s6 = smov [#allocation2]   ;;  %s43_s10 = scalar_lea.hbm %s128_s0, 128 }
   0x2   :  { %s14_s7 = sshll.u32 %s91_s6, 4  ;;  %p44_p0 = scmp.ne.s32.totalorder %s128_s0, %s43_s10  ;;  %s15_s7 = int_to_ptr.vmem [resolvable:$true] %s14_s7 }
   0x3   :  { %p47_p1 = scmp.lt.u32.totalorder %s43_s10, %s128_s0 }
   0x5   :  { %p49_p2 = pnand %p47_p1, %p44_p0 }
   0x7   :  { %52 = shalt.err (!%p49_p2)
}
   0x8   :  { %s53_s15 = scalar_lea.vmem %s15_s7, 128  ;;  %p58_p4 = scmp.lt.s32.totalorder %s15_s7, %s15_s7 }
   0x9   :  { %p54_p3 = scmp.ne.s32.totalorder %s15_s7, %s53_s15  ;;  %p59_p5 = scmp.lt.s32.totalorder %s53_s15, %s53_s15 }
   0xb   :  { %p60_p6 = por %p59_p5, %p58_p4 }
   0xd   :  { %p61_p7 = pnand %p60_p6, %p54_p3 }
   0xf   :  { %64 = shalt.err (!%p61_p7)
}
  0x10   :  { %17 = dma.hbm_to_vmem [thread:$0]  %s128_s0, 128, %s15_s7, [#allocation3]  }
  0x11   :  { %87 = dma.done.wait [#allocation3], 128  }
  0x12   :  { %88 = vsyncadd [#allocation3], 4294967168  ;;  %v21_v0 = vld [vmem:[#allocation2] sm:$0xff]  ;;  %s92_s18 = smov 1   ;;  %s93_s19 = smov [#allocation5]  }
  0x13   :  { %22 = vrot.lane.b32.xlu0 %v21_v0, %s92_s18  ;;  %s31_s20 = sshll.u32 %s93_s19, 4  ;;  %s32_s20 = int_to_ptr.vmem [resolvable:$true] %s31_s20 }
  0x14   :  { %s65_s21 = scalar_lea.vmem %s32_s20, 128  ;;  %p70_p9 = scmp.lt.s32.totalorder %s32_s20, %s32_s20 }
  0x15   :  { %p66_p8 = scmp.ne.s32.totalorder %s32_s20, %s65_s21  ;;  %p71_p10 = scmp.lt.s32.totalorder %s65_s21, %s65_s21 }
  0x17   :  { %p72_p11 = por %p71_p10, %p70_p9 }
  0x19   :  { %p73_p12 = pnand %p72_p11, %p66_p8 }
  0x85   :  { %v23_v1 = vpop.permute.xlu0 %22 }
  0x86   :  { %24 = vst [vmem:[#allocation5] sm:$0xff] %v23_v1 }
  0x87   :  { %76 = shalt.err (!%p73_p12)
}
  0x88   :  { %s77_s0 = scalar_lea.hbm %s129_s1, 128 }
  0x89   :  { %p78_p13 = scmp.ne.s32.totalorder %s129_s1, %s77_s0  ;;  %p81_p0 = scmp.lt.u32.totalorder %s77_s0, %s129_s1 }
  0x8b   :  { %p83_p1 = pnand %p81_p0, %p78_p13 }
  0x8d   :  { %86 = shalt.err (!%p83_p1)
}
  0x8e   :  { %34 = dma.vmem_to_hbm [thread:$0]  %s32_s20, 128, %s129_s1, [#allocation4]  }
  0x8f   :  { %89 = dma.done.wait [#allocation4], 128  }
  0x90   :  { %90 = vsyncadd [#allocation4], 4294967168 }
  0x91   :  { %38 = vsyncpa [#allocation3], 1 }
  0x92   :  { %39 = vsyncpa [#allocation4], 1 }

</bundles_post_ra>
